<compile_context>
chip_gen: v5e
topology: v5e:2x2
jax: 0.10.0
libtpu: 0.0.40
codegen_flags: <defaults>
</compile_context>

<pallas_src>
import functools

import jax
import jax.numpy as jnp
from jax import lax
from jax.experimental import pallas as pl
from jax.experimental.pallas import tpu as pltpu


_LANES = 128
_SUBLANES = 8
_CHUNK_ROWS = 32                       # inner-loop chunk: 32 sublanes x 128 lanes
_MIN_TILE = _CHUNK_ROWS * _LANES       # 4096 pixels; also covers bf16 (16,128)
                                       # and int8 (32,128) native tiles


def _dice_kernel(out_ref, mask_ref, o_ref,
                 inter_acc, osum_acc, msum_acc,
                 *, smooth, num_classes, pad_per_image):
    t = pl.program_id(1)
    nt = pl.num_programs(1)
    st = out_ref.shape[2]              # sublane extent of this spatial tile
    n_chunks = st // _CHUNK_ROWS       # static

    # Zero per-batch per-class accumulators (and the output tile, so a stray
    # writeback can never emit garbage) at the start of each batch row.
    @pl.when(t == 0)
    def _():
        inter_acc[...] = jnp.zeros_like(inter_acc)
        osum_acc[...] = jnp.zeros_like(osum_acc)
        msum_acc[...] = jnp.zeros_like(msum_acc)
        o_ref[...] = jnp.zeros(o_ref.shape, jnp.float32)

    def fold(v):
        # (CHUNK_ROWS, 128) -> (8, 128) with pure cross-vreg VPU adds (no XLU).
        return jnp.sum(
            v.reshape(_CHUNK_ROWS // _SUBLANES, _SUBLANES, _LANES), axis=0)

    zero8 = jnp.zeros((_SUBLANES, _LANES), jnp.float32)
    init = (tuple(zero8 for _ in range(num_classes)),
            tuple(zero8 for _ in range(num_classes)),
            tuple(zero8 for _ in range(num_classes)))

    def body(i, carry):
        inter_c, osum_c, msum_c = carry
        row0 = pl.multiple_of(i * _CHUNK_ROWS, _CHUNK_ROWS)

        mask = mask_ref[0, pl.ds(row0, _CHUNK_ROWS), :]          # (32,128) i32
        xs = [out_ref[0, c, pl.ds(row0, _CHUNK_ROWS), :].astype(jnp.float32)
              for c in range(num_classes)]                        # C x (32,128)

        # Softmax over the (small, static) class axis, fully unrolled: every
        # VPU/EUP op runs on lane/sublane-dense (32,128) tiles that fit in
        # registers (~4 vregs per operand), no cross-lane work.
        m = xs[0]
        for c in range(1, num_classes):
            m = jnp.maximum(m, xs[c])
        exps = [jnp.exp(x - m) for x in xs]
        denom = exps[0]
        for c in range(1, num_classes):
            denom = denom + exps[c]
        inv = pl.reciprocal(denom, approx=False)                  # EUP slot

        new_inter, new_osum, new_msum = [], [], []
        for c in range(num_classes):
            p = exps[c] * inv                                     # softmax prob
            oh = (mask == c).astype(jnp.float32)                  # one-hot slice
            new_inter.append(inter_c[c] + fold(p * oh))
            new_osum.append(osum_c[c] + fold(p))
            new_msum.append(msum_c[c] + fold(oh))
        return (tuple(new_inter), tuple(new_osum), tuple(new_msum))

    inter_t, osum_t, msum_t = lax.fori_loop(0, n_chunks, body, init)

    # One scratch update per grid step (not per chunk).
    for c in range(num_classes):
        inter_acc[c] += inter_t[c]
        osum_acc[c] += osum_t[c]
        msum_acc[c] += msum_t[c]

    # End of this batch's spatial loop.  NOTE: the output block stays resident
    # across the whole "arbitrary" t axis (same block index for every t), so it
    # is only meaningfully written here; do not reorder the grid axes.
    @pl.when(t == nt - 1)
    def _():
        # Analytic padding correction: padded pixels carry zero logits
        # (softmax == 1/C per class) and mask == -1 (zero one-hot), so they
        # over-count osum by exactly pad/C per class and nothing else.
        pad_corr = float(pad_per_image) / float(num_classes)
        dice_sum = jnp.float32(0.0)
        for c in range(num_classes):
            inter_s = jnp.sum(inter_acc[c])        # (8,128)->scalar, once/batch
            osum_s = jnp.sum(osum_acc[c]) - pad_corr
            msum_s = jnp.sum(msum_acc[c])
            dice_c = (2.0 * inter_s + smooth) / (osum_s + msum_s + smooth)
            dice_sum = dice_sum + dice_c
        o_ref[...] = jnp.zeros(o_ref.shape, jnp.float32) + dice_sum


def _vmem_capacity_bytes():
    try:
        return int(pltpu.get_tpu_info().vmem_capacity_bytes)
    except Exception:
        return 64 * 1024 * 1024   # conservative (v7x-sized) fallback


def _pick_spatial_tile(hw, num_classes, out_itemsize, mask_itemsize):
    """Pixels per grid step (multiple of 4096).  Target a double-buffered input
    footprint of ~1/8 of physical VMEM (v5e/v6e: ~16 MiB, v7x: ~8 MiB) so each
    step moves a multi-MiB block and the per-step overhead is amortized."""
    per_pixel = num_classes * out_itemsize + mask_itemsize
    footprint = max(4 << 20, min(_vmem_capacity_bytes() // 8, 16 << 20))
    per_block_budget = footprint // 2                       # double-buffered
    cap = max(_MIN_TILE,
              (per_block_budget // per_pixel) // _MIN_TILE * _MIN_TILE)
    cap = min(cap, 512 * 1024)                               # 512K pixels max
    hw_pad = -(-hw // _MIN_TILE) * _MIN_TILE
    n_tiles = max(1, -(-hw_pad // cap))
    per_tile = -(-hw_pad // n_tiles)
    return -(-per_tile // _MIN_TILE) * _MIN_TILE


def dice_loss(outputs, masks, smooth=1e-6, spatial_tile=None):
    """outputs: (B, C, H, W) float (f32 or bf16), masks: (B, H, W) integer."""
    B, C, H, W = outputs.shape
    HW = H * W

    masks = masks if masks.dtype == jnp.int32 else masks.astype(jnp.int32)
    mask_itemsize = jnp.dtype(jnp.int32).itemsize

    if spatial_tile is None:
        spatial_tile = _pick_spatial_tile(HW, C, outputs.dtype.itemsize,
                                          mask_itemsize)
    assert spatial_tile % _MIN_TILE == 0, "spatial_tile must be a multiple of 4096"

    n_tiles = -(-HW // spatial_tile)
    hw_pad = n_tiles * spatial_tile
    st = spatial_tile // _LANES
    pad = hw_pad - HW

    # Keep the model-output dtype (upcast to f32 in-VMEM after the block DMA).
    outs_flat = outputs.reshape(B, C, HW)
    masks_flat = masks.reshape(B, HW)
    if pad:
        # Padded logits are exactly zero and padded mask is -1; the kernel
        # corrects for them analytically (no per-pixel valid masking).
        outs_flat = jnp.pad(outs_flat, ((0, 0), (0, 0), (0, pad)))
        masks_flat = jnp.pad(masks_flat, ((0, 0), (0, pad)), constant_values=-1)

    outs4 = outs_flat.reshape(B, C, hw_pad // _LANES, _LANES)
    masks3 = masks_flat.reshape(B, hw_pad // _LANES, _LANES)

    block_bytes = spatial_tile * (C * outputs.dtype.itemsize + mask_itemsize)
    vmem_limit = min(_vmem_capacity_bytes() * 3 // 4,
                     max(32 << 20, 2 * block_bytes + (8 << 20)))

    kernel = functools.partial(_dice_kernel, smooth=float(smooth),
                               num_classes=C, pad_per_image=float(pad))

    per_batch = pl.pallas_call(
        kernel,
        out_shape=jax.ShapeDtypeStruct((B, _SUBLANES, _LANES), jnp.float32),
        grid_spec=pltpu.PrefetchScalarGridSpec(
            num_scalar_prefetch=0,
            grid=(B, n_tiles),
            in_specs=[
                pl.BlockSpec((1, C, st, _LANES), lambda b, t: (b, 0, t, 0)),
                pl.BlockSpec((1, st, _LANES), lambda b, t: (b, t, 0)),
            ],
            out_specs=pl.BlockSpec((1, _SUBLANES, _LANES), lambda b, t: (b, 0, 0)),
            scratch_shapes=[
                pltpu.VMEM((C, _SUBLANES, _LANES), jnp.float32),  # intersection
                pltpu.VMEM((C, _SUBLANES, _LANES), jnp.float32),  # softmax sum
                pltpu.VMEM((C, _SUBLANES, _LANES), jnp.float32),  # one-hot sum
            ],
        ),
        compiler_params=pltpu.CompilerParams(
            dimension_semantics=("parallel", "arbitrary"),
            vmem_limit_bytes=int(vmem_limit),
        ),
    )(outs4, masks3)

    dice_sums = per_batch[:, 0, 0]  # (B,) sum of per-class dice for each batch
    return 1.0 - jnp.sum(dice_sums) / jnp.float32(B * C)


def dice_loss_ref(outputs, masks, smooth=1e-6):
    """Pure-JAX reference mirroring the PyTorch module."""
    p = jax.nn.softmax(outputs.astype(jnp.float32), axis=1)
    C = outputs.shape[1]
    onehot = jax.nn.one_hot(masks.astype(jnp.int32), C, axis=1, dtype=jnp.float32)
    inter = jnp.sum(p * onehot, axis=(2, 3))
    union = jnp.sum(p, axis=(2, 3)) + jnp.sum(onehot, axis=(2, 3))
    dice = (2.0 * inter + smooth) / (union + smooth)
    return 1.0 - dice.mean()


if __name__ == "__main__":
    key = jax.random.PRNGKey(0)
    k1, k2 = jax.random.split(key)

    B, C, H, W = 2, 3, 16, 16  # small-shape stand-in for (B, 3, 512, 512)
    outputs = jax.random.normal(k1, (B, C, H, W), dtype=jnp.float32)
    masks = jax.random.randint(k2, (B, H, W), 0, C, dtype=jnp.int32)

    loss = dice_loss(outputs, masks)
    loss = jax.block_until_ready(loss)

    ref = dice_loss_ref(outputs, masks)
    assert jnp.allclose(loss, ref, atol=1e-3, rtol=1e-3), (loss, ref)

    print("KERNEL_OK")
</pallas_src>

<mosaic_0001>
module attributes {stable_mosaic.version = 11 : i64} {
  func.func @_dice_kernel(%arg0: i32, %arg1: i32, %arg2: memref<1x3x32x128xf32, #tpu.memory_space<vmem>>, %arg3: memref<1x32x128xi32, #tpu.memory_space<vmem>>, %arg4: memref<1x8x128xf32, #tpu.memory_space<vmem>>, %arg5: memref<3x8x128xf32, #tpu.memory_space<vmem>>, %arg6: memref<3x8x128xf32, #tpu.memory_space<vmem>>, %arg7: memref<3x8x128xf32, #tpu.memory_space<vmem>>) attributes {dimension_semantics = [#tpu.dimension_semantics<parallel>, #tpu.dimension_semantics<arbitrary>], iteration_bounds = array<i64: 2, 1>, scalar_prefetch = 0 : i64, scratch_operands = 3 : i64, tpu.core_type = #tpu.core_type<tc>, window_params = [{transform_indices = @transform_0, window_bounds = array<i64: 1, 3, 32, 128>}, {transform_indices = @transform_1, window_bounds = array<i64: 1, 32, 128>}, {transform_indices = @transform_2, window_bounds = array<i64: 1, 8, 128>}]} {
    %c0_i32 = arith.constant 0 : i32
    %0 = arith.cmpi eq, %arg1, %c0_i32 : i32
    %1 = arith.extui %0 : i1 to i32
    %c0_i32_0 = arith.constant 0 : i32
    %2 = arith.cmpi ne, %1, %c0_i32_0 : i32
    scf.if %2 {
      %cst_77 = arith.constant 0.000000e+00 : f32
      %131 = vector.broadcast %cst_77 : f32 to vector<3x8x128xf32>
      %c0_78 = arith.constant 0 : index
      %c0_79 = arith.constant 0 : index
      %c0_80 = arith.constant 0 : index
      %132 = vector.load %arg5[%c0_78, %c0_79, %c0_80] : memref<3x8x128xf32, #tpu.memory_space<vmem>>, vector<3x8x128xf32>
      tpu.vector_store %arg5[%c0_78, %c0_79, %c0_80], %131 {strides = array<i32>} : memref<3x8x128xf32, #tpu.memory_space<vmem>>, vector<3x8x128xf32>,
      %cst_81 = arith.constant 0.000000e+00 : f32
      %133 = vector.broadcast %cst_81 : f32 to vector<3x8x128xf32>
      %c0_82 = arith.constant 0 : index
      %c0_83 = arith.constant 0 : index
      %c0_84 = arith.constant 0 : index
      %134 = vector.load %arg6[%c0_82, %c0_83, %c0_84] : memref<3x8x128xf32, #tpu.memory_space<vmem>>, vector<3x8x128xf32>
      tpu.vector_store %arg6[%c0_82, %c0_83, %c0_84], %133 {strides = array<i32>} : memref<3x8x128xf32, #tpu.memory_space<vmem>>, vector<3x8x128xf32>,
      %cst_85 = arith.constant 0.000000e+00 : f32
      %135 = vector.broadcast %cst_85 : f32 to vector<3x8x128xf32>
      %c0_86 = arith.constant 0 : index
      %c0_87 = arith.constant 0 : index
      %c0_88 = arith.constant 0 : index
      %136 = vector.load %arg7[%c0_86, %c0_87, %c0_88] : memref<3x8x128xf32, #tpu.memory_space<vmem>>, vector<3x8x128xf32>
      tpu.vector_store %arg7[%c0_86, %c0_87, %c0_88], %135 {strides = array<i32>} : memref<3x8x128xf32, #tpu.memory_space<vmem>>, vector<3x8x128xf32>,
      %cst_89 = arith.constant 0.000000e+00 : f32
      %137 = vector.broadcast %cst_89 : f32 to vector<1x8x128xf32>
      %c0_90 = arith.constant 0 : index
      %c0_91 = arith.constant 0 : index
      %c0_92 = arith.constant 0 : index
      %138 = vector.load %arg4[%c0_90, %c0_91, %c0_92] : memref<1x8x128xf32, #tpu.memory_space<vmem>>, vector<1x8x128xf32>
      tpu.vector_store %arg4[%c0_90, %c0_91, %c0_92], %137 {strides = array<i32>} : memref<1x8x128xf32, #tpu.memory_space<vmem>>, vector<1x8x128xf32>,
    } else {
    }
    %cst = arith.constant 0.000000e+00 : f32
    %3 = vector.broadcast %cst : f32 to vector<8x128xf32>
    %c0_i32_1 = arith.constant 0 : i32
    %c32_i32 = arith.constant 32 : i32
    %4 = arith.muli %c0_i32_1, %c32_i32 : i32
    %5 = tpu.assume_multiple %4, 32 : i32
    %c0 = arith.constant 0 : index
    %6 = arith.index_cast %5 : i32 to index
    %c0_2 = arith.constant 0 : index
    %7 = vector.load %arg3[%c0, %6, %c0_2] : memref<1x32x128xi32, #tpu.memory_space<vmem>>, vector<1x32x128xi32>
    %8 = vector.shape_cast %7 : vector<1x32x128xi32> to vector<32x128xi32>
    %c0_3 = arith.constant 0 : index
    %c0_4 = arith.constant 0 : index
    %9 = arith.index_cast %5 : i32 to index
    %c0_5 = arith.constant 0 : index
    %10 = vector.load %arg2[%c0_3, %c0_4, %9, %c0_5] : memref<1x3x32x128xf32, #tpu.memory_space<vmem>>, vector<1x1x32x128xf32>
    %11 = vector.shape_cast %10 : vector<1x1x32x128xf32> to vector<32x128xf32>
    %c0_6 = arith.constant 0 : index
    %c1 = arith.constant 1 : index
    %12 = arith.index_cast %5 : i32 to index
    %c0_7 = arith.constant 0 : index
    %13 = vector.load %arg2[%c0_6, %c1, %12, %c0_7] : memref<1x3x32x128xf32, #tpu.memory_space<vmem>>, vector<1x1x32x128xf32>
    %14 = vector.shape_cast %13 : vector<1x1x32x128xf32> to vector<32x128xf32>
    %c0_8 = arith.constant 0 : index
    %c2 = arith.constant 2 : index
    %15 = arith.index_cast %5 : i32 to index
    %c0_9 = arith.constant 0 : index
    %16 = vector.load %arg2[%c0_8, %c2, %15, %c0_9] : memref<1x3x32x128xf32, #tpu.memory_space<vmem>>, vector<1x1x32x128xf32>
    %17 = vector.shape_cast %16 : vector<1x1x32x128xf32> to vector<32x128xf32>
    %18 = arith.maximumf %11, %14 : vector<32x128xf32>
    %19 = arith.maximumf %18, %17 : vector<32x128xf32>
    %20 = arith.subf %11, %19 : vector<32x128xf32>
    %21 = math.exp %20 : vector<32x128xf32>
    %22 = arith.subf %14, %19 : vector<32x128xf32>
    %23 = math.exp %22 : vector<32x128xf32>
    %24 = arith.subf %17, %19 : vector<32x128xf32>
    %25 = math.exp %24 : vector<32x128xf32>
    %26 = arith.addf %21, %23 : vector<32x128xf32>
    %27 = arith.addf %26, %25 : vector<32x128xf32>
    %28 = tpu.reciprocal %27 : vector<32x128xf32> -> vector<32x128xf32>
    %29 = arith.mulf %21, %28 : vector<32x128xf32>
    %c0_i32_10 = arith.constant 0 : i32
    %30 = vector.broadcast %c0_i32_10 : i32 to vector<32x128xi32>
    %31 = arith.cmpi eq, %8, %30 : vector<32x128xi32>
    %32 = arith.extui %31 : vector<32x128xi1> to vector<32x128xi32>
    %33 = arith.sitofp %32 : vector<32x128xi32> to vector<32x128xf32>
    %34 = arith.mulf %29, %33 : vector<32x128xf32>
    %35 = vector.shape_cast %34 : vector<32x128xf32> to vector<4x8x128xf32>
    %cst_11 = arith.constant dense<0.000000e+00> : vector<8x128xf32>
    %36 = vector.multi_reduction <add>, %35, %cst_11 [0] : vector<4x8x128xf32> to vector<8x128xf32>
    %37 = arith.addf %3, %36 : vector<8x128xf32>
    %38 = vector.shape_cast %29 : vector<32x128xf32> to vector<4x8x128xf32>
    %cst_12 = arith.constant dense<0.000000e+00> : vector<8x128xf32>
    %39 = vector.multi_reduction <add>, %38, %cst_12 [0] : vector<4x8x128xf32> to vector<8x128xf32>
    %40 = arith.addf %3, %39 : vector<8x128xf32>
    %41 = vector.shape_cast %33 : vector<32x128xf32> to vector<4x8x128xf32>
    %cst_13 = arith.constant dense<0.000000e+00> : vector<8x128xf32>
    %42 = vector.multi_reduction <add>, %41, %cst_13 [0] : vector<4x8x128xf32> to vector<8x128xf32>
    %43 = arith.addf %3, %42 : vector<8x128xf32>
    %44 = arith.mulf %23, %28 : vector<32x128xf32>
    %c1_i32 = arith.constant 1 : i32
    %45 = vector.broadcast %c1_i32 : i32 to vector<32x128xi32>
    %46 = arith.cmpi eq, %8, %45 : vector<32x128xi32>
    %47 = arith.extui %46 : vector<32x128xi1> to vector<32x128xi32>
    %48 = arith.sitofp %47 : vector<32x128xi32> to vector<32x128xf32>
    %49 = arith.mulf %44, %48 : vector<32x128xf32>
    %50 = vector.shape_cast %49 : vector<32x128xf32> to vector<4x8x128xf32>
    %cst_14 = arith.constant dense<0.000000e+00> : vector<8x128xf32>
    %51 = vector.multi_reduction <add>, %50, %cst_14 [0] : vector<4x8x128xf32> to vector<8x128xf32>
    %52 = arith.addf %3, %51 : vector<8x128xf32>
    %53 = vector.shape_cast %44 : vector<32x128xf32> to vector<4x8x128xf32>
    %cst_15 = arith.constant dense<0.000000e+00> : vector<8x128xf32>
    %54 = vector.multi_reduction <add>, %53, %cst_15 [0] : vector<4x8x128xf32> to vector<8x128xf32>
    %55 = arith.addf %3, %54 : vector<8x128xf32>
    %56 = vector.shape_cast %48 : vector<32x128xf32> to vector<4x8x128xf32>
    %cst_16 = arith.constant dense<0.000000e+00> : vector<8x128xf32>
    %57 = vector.multi_reduction <add>, %56, %cst_16 [0] : vector<4x8x128xf32> to vector<8x128xf32>
    %58 = arith.addf %3, %57 : vector<8x128xf32>
    %59 = arith.mulf %25, %28 : vector<32x128xf32>
    %c2_i32 = arith.constant 2 : i32
    %60 = vector.broadcast %c2_i32 : i32 to vector<32x128xi32>
    %61 = arith.cmpi eq, %8, %60 : vector<32x128xi32>
    %62 = arith.extui %61 : vector<32x128xi1> to vector<32x128xi32>
    %63 = arith.sitofp %62 : vector<32x128xi32> to vector<32x128xf32>
    %64 = arith.mulf %59, %63 : vector<32x128xf32>
    %65 = vector.shape_cast %64 : vector<32x128xf32> to vector<4x8x128xf32>
    %cst_17 = arith.constant dense<0.000000e+00> : vector<8x128xf32>
    %66 = vector.multi_reduction <add>, %65, %cst_17 [0] : vector<4x8x128xf32> to vector<8x128xf32>
    %67 = arith.addf %3, %66 : vector<8x128xf32>
    %68 = vector.shape_cast %59 : vector<32x128xf32> to vector<4x8x128xf32>
    %cst_18 = arith.constant dense<0.000000e+00> : vector<8x128xf32>
    %69 = vector.multi_reduction <add>, %68, %cst_18 [0] : vector<4x8x128xf32> to vector<8x128xf32>
    %70 = arith.addf %3, %69 : vector<8x128xf32>
    %71 = vector.shape_cast %63 : vector<32x128xf32> to vector<4x8x128xf32>
    %cst_19 = arith.constant dense<0.000000e+00> : vector<8x128xf32>
    %72 = vector.multi_reduction <add>, %71, %cst_19 [0] : vector<4x8x128xf32> to vector<8x128xf32>
    %73 = arith.addf %3, %72 : vector<8x128xf32>
    %c1_i32_20 = arith.constant 1 : i32
    %c0_21 = arith.constant 0 : index
    %c0_22 = arith.constant 0 : index
    %c0_23 = arith.constant 0 : index
    %74 = vector.load %arg5[%c0_21, %c0_22, %c0_23] : memref<3x8x128xf32, #tpu.memory_space<vmem>>, vector<1x8x128xf32>
    %75 = vector.shape_cast %74 : vector<1x8x128xf32> to vector<8x128xf32>
    %76 = arith.addf %75, %37 : vector<8x128xf32>
    %c0_24 = arith.constant 0 : index
    %c0_25 = arith.constant 0 : index
    %c0_26 = arith.constant 0 : index
    %77 = vector.load %arg5[%c0_24, %c0_25, %c0_26] : memref<3x8x128xf32, #tpu.memory_space<vmem>>, vector<1x8x128xf32>
    %78 = vector.shape_cast %77 : vector<1x8x128xf32> to vector<8x128xf32>
    %79 = vector.shape_cast %76 : vector<8x128xf32> to vector<1x8x128xf32>
    tpu.vector_store %arg5[%c0_24, %c0_25, %c0_26], %79 {strides = array<i32>} : memref<3x8x128xf32, #tpu.memory_space<vmem>>, vector<1x8x128xf32>,
    %c0_27 = arith.constant 0 : index
    %c0_28 = arith.constant 0 : index
    %c0_29 = arith.constant 0 : index
    %80 = vector.load %arg6[%c0_27, %c0_28, %c0_29] : memref<3x8x128xf32, #tpu.memory_space<vmem>>, vector<1x8x128xf32>
    %81 = vector.shape_cast %80 : vector<1x8x128xf32> to vector<8x128xf32>
    %82 = arith.addf %81, %40 : vector<8x128xf32>
    %c0_30 = arith.constant 0 : index
    %c0_31 = arith.constant 0 : index
    %c0_32 = arith.constant 0 : index
    %83 = vector.load %arg6[%c0_30, %c0_31, %c0_32] : memref<3x8x128xf32, #tpu.memory_space<vmem>>, vector<1x8x128xf32>
    %84 = vector.shape_cast %83 : vector<1x8x128xf32> to vector<8x128xf32>
    %85 = vector.shape_cast %82 : vector<8x128xf32> to vector<1x8x128xf32>
    tpu.vector_store %arg6[%c0_30, %c0_31, %c0_32], %85 {strides = array<i32>} : memref<3x8x128xf32, #tpu.memory_space<vmem>>, vector<1x8x128xf32>,
    %c0_33 = arith.constant 0 : index
    %c0_34 = arith.constant 0 : index
    %c0_35 = arith.constant 0 : index
    %86 = vector.load %arg7[%c0_33, %c0_34, %c0_35] : memref<3x8x128xf32, #tpu.memory_space<vmem>>, vector<1x8x128xf32>
    %87 = vector.shape_cast %86 : vector<1x8x128xf32> to vector<8x128xf32>
    %88 = arith.addf %87, %43 : vector<8x128xf32>
    %c0_36 = arith.constant 0 : index
    %c0_37 = arith.constant 0 : index
    %c0_38 = arith.constant 0 : index
    %89 = vector.load %arg7[%c0_36, %c0_37, %c0_38] : memref<3x8x128xf32, #tpu.memory_space<vmem>>, vector<1x8x128xf32>
    %90 = vector.shape_cast %89 : vector<1x8x128xf32> to vector<8x128xf32>
    %91 = vector.shape_cast %88 : vector<8x128xf32> to vector<1x8x128xf32>
    tpu.vector_store %arg7[%c0_36, %c0_37, %c0_38], %91 {strides = array<i32>} : memref<3x8x128xf32, #tpu.memory_space<vmem>>, vector<1x8x128xf32>,
    %c1_39 = arith.constant 1 : index
    %c0_40 = arith.constant 0 : index
    %c0_41 = arith.constant 0 : index
    %92 = vector.load %arg5[%c1_39, %c0_40, %c0_41] : memref<3x8x128xf32, #tpu.memory_space<vmem>>, vector<1x8x128xf32>
    %93 = vector.shape_cast %92 : vector<1x8x128xf32> to vector<8x128xf32>
    %94 = arith.addf %93, %52 : vector<8x128xf32>
    %c1_42 = arith.constant 1 : index
    %c0_43 = arith.constant 0 : index
    %c0_44 = arith.constant 0 : index
    %95 = vector.load %arg5[%c1_42, %c0_43, %c0_44] : memref<3x8x128xf32, #tpu.memory_space<vmem>>, vector<1x8x128xf32>
    %96 = vector.shape_cast %95 : vector<1x8x128xf32> to vector<8x128xf32>
    %97 = vector.shape_cast %94 : vector<8x128xf32> to vector<1x8x128xf32>
    tpu.vector_store %arg5[%c1_42, %c0_43, %c0_44], %97 {strides = array<i32>} : memref<3x8x128xf32, #tpu.memory_space<vmem>>, vector<1x8x128xf32>,
    %c1_45 = arith.constant 1 : index
    %c0_46 = arith.constant 0 : index
    %c0_47 = arith.constant 0 : index
    %98 = vector.load %arg6[%c1_45, %c0_46, %c0_47] : memref<3x8x128xf32, #tpu.memory_space<vmem>>, vector<1x8x128xf32>
    %99 = vector.shape_cast %98 : vector<1x8x128xf32> to vector<8x128xf32>
    %100 = arith.addf %99, %55 : vector<8x128xf32>
    %c1_48 = arith.constant 1 : index
    %c0_49 = arith.constant 0 : index
    %c0_50 = arith.constant 0 : index
    %101 = vector.load %arg6[%c1_48, %c0_49, %c0_50] : memref<3x8x128xf32, #tpu.memory_space<vmem>>, vector<1x8x128xf32>
    %102 = vector.shape_cast %101 : vector<1x8x128xf32> to vector<8x128xf32>
    %103 = vector.shape_cast %100 : vector<8x128xf32> to vector<1x8x128xf32>
    tpu.vector_store %arg6[%c1_48, %c0_49, %c0_50], %103 {strides = array<i32>} : memref<3x8x128xf32, #tpu.memory_space<vmem>>, vector<1x8x128xf32>,
    %c1_51 = arith.constant 1 : index
    %c0_52 = arith.constant 0 : index
    %c0_53 = arith.constant 0 : index
    %104 = vector.load %arg7[%c1_51, %c0_52, %c0_53] : memref<3x8x128xf32, #tpu.memory_space<vmem>>, vector<1x8x128xf32>
    %105 = vector.shape_cast %104 : vector<1x8x128xf32> to vector<8x128xf32>
    %106 = arith.addf %105, %58 : vector<8x128xf32>
    %c1_54 = arith.constant 1 : index
    %c0_55 = arith.constant 0 : index
    %c0_56 = arith.constant 0 : index
    %107 = vector.load %arg7[%c1_54, %c0_55, %c0_56] : memref<3x8x128xf32, #tpu.memory_space<vmem>>, vector<1x8x128xf32>
    %108 = vector.shape_cast %107 : vector<1x8x128xf32> to vector<8x128xf32>
    %109 = vector.shape_cast %106 : vector<8x128xf32> to vector<1x8x128xf32>
    tpu.vector_store %arg7[%c1_54, %c0_55, %c0_56], %109 {strides = array<i32>} : memref<3x8x128xf32, #tpu.memory_space<vmem>>, vector<1x8x128xf32>,
    %c2_57 = arith.constant 2 : index
    %c0_58 = arith.constant 0 : index
    %c0_59 = arith.constant 0 : index
    %110 = vector.load %arg5[%c2_57, %c0_58, %c0_59] : memref<3x8x128xf32, #tpu.memory_space<vmem>>, vector<1x8x128xf32>
    %111 = vector.shape_cast %110 : vector<1x8x128xf32> to vector<8x128xf32>
    %112 = arith.addf %111, %67 : vector<8x128xf32>
    %c2_60 = arith.constant 2 : index
    %c0_61 = arith.constant 0 : index
    %c0_62 = arith.constant 0 : index
    %113 = vector.load %arg5[%c2_60, %c0_61, %c0_62] : memref<3x8x128xf32, #tpu.memory_space<vmem>>, vector<1x8x128xf32>
    %114 = vector.shape_cast %113 : vector<1x8x128xf32> to vector<8x128xf32>
    %115 = vector.shape_cast %112 : vector<8x128xf32> to vector<1x8x128xf32>
    tpu.vector_store %arg5[%c2_60, %c0_61, %c0_62], %115 {strides = array<i32>} : memref<3x8x128xf32, #tpu.memory_space<vmem>>, vector<1x8x128xf32>,
    %c2_63 = arith.constant 2 : index
    %c0_64 = arith.constant 0 : index
    %c0_65 = arith.constant 0 : index
    %116 = vector.load %arg6[%c2_63, %c0_64, %c0_65] : memref<3x8x128xf32, #tpu.memory_space<vmem>>, vector<1x8x128xf32>
    %117 = vector.shape_cast %116 : vector<1x8x128xf32> to vector<8x128xf32>
    %118 = arith.addf %117, %70 : vector<8x128xf32>
    %c2_66 = arith.constant 2 : index
    %c0_67 = arith.constant 0 : index
    %c0_68 = arith.constant 0 : index
    %119 = vector.load %arg6[%c2_66, %c0_67, %c0_68] : memref<3x8x128xf32, #tpu.memory_space<vmem>>, vector<1x8x128xf32>
    %120 = vector.shape_cast %119 : vector<1x8x128xf32> to vector<8x128xf32>
    %121 = vector.shape_cast %118 : vector<8x128xf32> to vector<1x8x128xf32>
    tpu.vector_store %arg6[%c2_66, %c0_67, %c0_68], %121 {strides = array<i32>} : memref<3x8x128xf32, #tpu.memory_space<vmem>>, vector<1x8x128xf32>,
    %c2_69 = arith.constant 2 : index
    %c0_70 = arith.constant 0 : index
    %c0_71 = arith.constant 0 : index
    %122 = vector.load %arg7[%c2_69, %c0_70, %c0_71] : memref<3x8x128xf32, #tpu.memory_space<vmem>>, vector<1x8x128xf32>
    %123 = vector.shape_cast %122 : vector<1x8x128xf32> to vector<8x128xf32>
    %124 = arith.addf %123, %73 : vector<8x128xf32>
    %c2_72 = arith.constant 2 : index
    %c0_73 = arith.constant 0 : index
    %c0_74 = arith.constant 0 : index
    %125 = vector.load %arg7[%c2_72, %c0_73, %c0_74] : memref<3x8x128xf32, #tpu.memory_space<vmem>>, vector<1x8x128xf32>
    %126 = vector.shape_cast %125 : vector<1x8x128xf32> to vector<8x128xf32>
    %127 = vector.shape_cast %124 : vector<8x128xf32> to vector<1x8x128xf32>
    tpu.vector_store %arg7[%c2_72, %c0_73, %c0_74], %127 {strides = array<i32>} : memref<3x8x128xf32, #tpu.memory_space<vmem>>, vector<1x8x128xf32>,
    %c0_i32_75 = arith.constant 0 : i32
    %128 = arith.cmpi eq, %arg1, %c0_i32_75 : i32
    %129 = arith.extui %128 : i1 to i32
    %c0_i32_76 = arith.constant 0 : i32
    %130 = arith.cmpi ne, %129, %c0_i32_76 : i32
    scf.if %130 {
      %c0_77 = arith.constant 0 : index
      %c0_78 = arith.constant 0 : index
      %c0_79 = arith.constant 0 : index
      %131 = vector.load %arg5[%c0_77, %c0_78, %c0_79] : memref<3x8x128xf32, #tpu.memory_space<vmem>>, vector<1x8x128xf32>
      %132 = vector.shape_cast %131 : vector<1x8x128xf32> to vector<8x128xf32>
      %133 = vector.shape_cast %132 : vector<8x128xf32> to vector<1x8x128xf32>
      %cst_80 = arith.constant dense<0.000000e+00> : vector<1xf32>
      %134 = vector.multi_reduction <add>, %133, %cst_80 [1, 2] : vector<1x8x128xf32> to vector<1xf32>
      %135 = vector.shape_cast %134 : vector<1xf32> to vector<1x1x1xf32>
      %136 = vector.extract %135[0, 0, 0] : f32 from vector<1x1x1xf32>
      %c0_81 = arith.constant 0 : index
      %c0_82 = arith.constant 0 : index
      %c0_83 = arith.constant 0 : index
      %137 = vector.load %arg6[%c0_81, %c0_82, %c0_83] : memref<3x8x128xf32, #tpu.memory_space<vmem>>, vector<1x8x128xf32>
      %138 = vector.shape_cast %137 : vector<1x8x128xf32> to vector<8x128xf32>
      %139 = vector.shape_cast %138 : vector<8x128xf32> to vector<1x8x128xf32>
      %cst_84 = arith.constant dense<0.000000e+00> : vector<1xf32>
      %140 = vector.multi_reduction <add>, %139, %cst_84 [1, 2] : vector<1x8x128xf32> to vector<1xf32>
      %141 = vector.shape_cast %140 : vector<1xf32> to vector<1x1x1xf32>
      %142 = vector.extract %141[0, 0, 0] : f32 from vector<1x1x1xf32>
      %cst_85 = arith.constant 1.280000e+03 : f32
      %143 = arith.subf %142, %cst_85 : f32
      %c0_86 = arith.constant 0 : index
      %c0_87 = arith.constant 0 : index
      %c0_88 = arith.constant 0 : index
      %144 = vector.load %arg7[%c0_86, %c0_87, %c0_88] : memref<3x8x128xf32, #tpu.memory_space<vmem>>, vector<1x8x128xf32>
      %145 = vector.shape_cast %144 : vector<1x8x128xf32> to vector<8x128xf32>
      %146 = vector.shape_cast %145 : vector<8x128xf32> to vector<1x8x128xf32>
      %cst_89 = arith.constant dense<0.000000e+00> : vector<1xf32>
      %147 = vector.multi_reduction <add>, %146, %cst_89 [1, 2] : vector<1x8x128xf32> to vector<1xf32>
      %148 = vector.shape_cast %147 : vector<1xf32> to vector<1x1x1xf32>
      %149 = vector.extract %148[0, 0, 0] : f32 from vector<1x1x1xf32>
      %cst_90 = arith.constant 2.000000e+00 : f32
      %150 = arith.mulf %cst_90, %136 : f32
      %cst_91 = arith.constant 9.99999997E-7 : f32
      %151 = arith.addf %150, %cst_91 : f32
      %152 = arith.addf %143, %149 : f32
      %cst_92 = arith.constant 9.99999997E-7 : f32
      %153 = arith.addf %152, %cst_92 : f32
      %154 = arith.divf %151, %153 : f32
      %cst_93 = arith.constant 0.000000e+00 : f32
      %155 = arith.addf %cst_93, %154 : f32
      %c1_94 = arith.constant 1 : index
      %c0_95 = arith.constant 0 : index
      %c0_96 = arith.constant 0 : index
      %156 = vector.load %arg5[%c1_94, %c0_95, %c0_96] : memref<3x8x128xf32, #tpu.memory_space<vmem>>, vector<1x8x128xf32>
      %157 = vector.shape_cast %156 : vector<1x8x128xf32> to vector<8x128xf32>
      %158 = vector.shape_cast %157 : vector<8x128xf32> to vector<1x8x128xf32>
      %cst_97 = arith.constant dense<0.000000e+00> : vector<1xf32>
      %159 = vector.multi_reduction <add>, %158, %cst_97 [1, 2] : vector<1x8x128xf32> to vector<1xf32>
      %160 = vector.shape_cast %159 : vector<1xf32> to vector<1x1x1xf32>
      %161 = vector.extract %160[0, 0, 0] : f32 from vector<1x1x1xf32>
      %c1_98 = arith.constant 1 : index
      %c0_99 = arith.constant 0 : index
      %c0_100 = arith.constant 0 : index
      %162 = vector.load %arg6[%c1_98, %c0_99, %c0_100] : memref<3x8x128xf32, #tpu.memory_space<vmem>>, vector<1x8x128xf32>
      %163 = vector.shape_cast %162 : vector<1x8x128xf32> to vector<8x128xf32>
      %164 = vector.shape_cast %163 : vector<8x128xf32> to vector<1x8x128xf32>
      %cst_101 = arith.constant dense<0.000000e+00> : vector<1xf32>
      %165 = vector.multi_reduction <add>, %164, %cst_101 [1, 2] : vector<1x8x128xf32> to vector<1xf32>
      %166 = vector.shape_cast %165 : vector<1xf32> to vector<1x1x1xf32>
      %167 = vector.extract %166[0, 0, 0] : f32 from vector<1x1x1xf32>
      %cst_102 = arith.constant 1.280000e+03 : f32
      %168 = arith.subf %167, %cst_102 : f32
      %c1_103 = arith.constant 1 : index
      %c0_104 = arith.constant 0 : index
      %c0_105 = arith.constant 0 : index
      %169 = vector.load %arg7[%c1_103, %c0_104, %c0_105] : memref<3x8x128xf32, #tpu.memory_space<vmem>>, vector<1x8x128xf32>
      %170 = vector.shape_cast %169 : vector<1x8x128xf32> to vector<8x128xf32>
      %171 = vector.shape_cast %170 : vector<8x128xf32> to vector<1x8x128xf32>
      %cst_106 = arith.constant dense<0.000000e+00> : vector<1xf32>
      %172 = vector.multi_reduction <add>, %171, %cst_106 [1, 2] : vector<1x8x128xf32> to vector<1xf32>
      %173 = vector.shape_cast %172 : vector<1xf32> to vector<1x1x1xf32>
      %174 = vector.extract %173[0, 0, 0] : f32 from vector<1x1x1xf32>
      %cst_107 = arith.constant 2.000000e+00 : f32
      %175 = arith.mulf %cst_107, %161 : f32
      %cst_108 = arith.constant 9.99999997E-7 : f32
      %176 = arith.addf %175, %cst_108 : f32
      %177 = arith.addf %168, %174 : f32
      %cst_109 = arith.constant 9.99999997E-7 : f32
      %178 = arith.addf %177, %cst_109 : f32
      %179 = arith.divf %176, %178 : f32
      %180 = arith.addf %155, %179 : f32
      %c2_110 = arith.constant 2 : index
      %c0_111 = arith.constant 0 : index
      %c0_112 = arith.constant 0 : index
      %181 = vector.load %arg5[%c2_110, %c0_111, %c0_112] : memref<3x8x128xf32, #tpu.memory_space<vmem>>, vector<1x8x128xf32>
      %182 = vector.shape_cast %181 : vector<1x8x128xf32> to vector<8x128xf32>
      %183 = vector.shape_cast %182 : vector<8x128xf32> to vector<1x8x128xf32>
      %cst_113 = arith.constant dense<0.000000e+00> : vector<1xf32>
      %184 = vector.multi_reduction <add>, %183, %cst_113 [1, 2] : vector<1x8x128xf32> to vector<1xf32>
      %185 = vector.shape_cast %184 : vector<1xf32> to vector<1x1x1xf32>
      %186 = vector.extract %185[0, 0, 0] : f32 from vector<1x1x1xf32>
      %c2_114 = arith.constant 2 : index
      %c0_115 = arith.constant 0 : index
      %c0_116 = arith.constant 0 : index
      %187 = vector.load %arg6[%c2_114, %c0_115, %c0_116] : memref<3x8x128xf32, #tpu.memory_space<vmem>>, vector<1x8x128xf32>
      %188 = vector.shape_cast %187 : vector<1x8x128xf32> to vector<8x128xf32>
      %189 = vector.shape_cast %188 : vector<8x128xf32> to vector<1x8x128xf32>
      %cst_117 = arith.constant dense<0.000000e+00> : vector<1xf32>
      %190 = vector.multi_reduction <add>, %189, %cst_117 [1, 2] : vector<1x8x128xf32> to vector<1xf32>
      %191 = vector.shape_cast %190 : vector<1xf32> to vector<1x1x1xf32>
      %192 = vector.extract %191[0, 0, 0] : f32 from vector<1x1x1xf32>
      %cst_118 = arith.constant 1.280000e+03 : f32
      %193 = arith.subf %192, %cst_118 : f32
      %c2_119 = arith.constant 2 : index
      %c0_120 = arith.constant 0 : index
      %c0_121 = arith.constant 0 : index
      %194 = vector.load %arg7[%c2_119, %c0_120, %c0_121] : memref<3x8x128xf32, #tpu.memory_space<vmem>>, vector<1x8x128xf32>
      %195 = vector.shape_cast %194 : vector<1x8x128xf32> to vector<8x128xf32>
      %196 = vector.shape_cast %195 : vector<8x128xf32> to vector<1x8x128xf32>
      %cst_122 = arith.constant dense<0.000000e+00> : vector<1xf32>
      %197 = vector.multi_reduction <add>, %196, %cst_122 [1, 2] : vector<1x8x128xf32> to vector<1xf32>
      %198 = vector.shape_cast %197 : vector<1xf32> to vector<1x1x1xf32>
      %199 = vector.extract %198[0, 0, 0] : f32 from vector<1x1x1xf32>
      %cst_123 = arith.constant 2.000000e+00 : f32
      %200 = arith.mulf %cst_123, %186 : f32
      %cst_124 = arith.constant 9.99999997E-7 : f32
      %201 = arith.addf %200, %cst_124 : f32
      %202 = arith.addf %193, %199 : f32
      %cst_125 = arith.constant 9.99999997E-7 : f32
      %203 = arith.addf %202, %cst_125 : f32
      %204 = arith.divf %201, %203 : f32
      %205 = arith.addf %180, %204 : f32
      %cst_126 = arith.constant 0.000000e+00 : f32
      %206 = vector.broadcast %cst_126 : f32 to vector<1x8x128xf32>
      %207 = vector.broadcast %205 : f32 to vector<1x8x128xf32>
      %208 = arith.addf %206, %207 : vector<1x8x128xf32>
      %c0_127 = arith.constant 0 : index
      %c0_128 = arith.constant 0 : index
      %c0_129 = arith.constant 0 : index
      %209 = vector.load %arg4[%c0_127, %c0_128, %c0_129] : memref<1x8x128xf32, #tpu.memory_space<vmem>>, vector<1x8x128xf32>
      tpu.vector_store %arg4[%c0_127, %c0_128, %c0_129], %208 {strides = array<i32>} : memref<1x8x128xf32, #tpu.memory_space<vmem>>, vector<1x8x128xf32>,
    } else {
    }
    return
  }
  func.func @transform_0(%arg0: i32, %arg1: i32) -> (i32, i32, i32, i32) {
    %c0_i32 = arith.constant 0 : i32
    %c0_i32_0 = arith.constant 0 : i32
    %c0_i32_1 = arith.constant 0 : i32
    return %arg0, %c0_i32, %arg1, %c0_i32_0 : i32, i32, i32, i32
  }
  func.func @transform_1(%arg0: i32, %arg1: i32) -> (i32, i32, i32) {
    %c0_i32 = arith.constant 0 : i32
    %c0_i32_0 = arith.constant 0 : i32
    return %arg0, %arg1, %c0_i32 : i32, i32, i32
  }
  func.func @transform_2(%arg0: i32, %arg1: i32) -> (i32, i32, i32) {
    %c0_i32 = arith.constant 0 : i32
    %c0_i32_0 = arith.constant 0 : i32
    %c0_i32_1 = arith.constant 0 : i32
    return %arg0, %c0_i32, %c0_i32_0 : i32, i32, i32
  }
}

</mosaic_0001>

<bundles_post_ra>
// kernel: tpu_custom_call.1
= control target key start
LH: loop header
LB: loop body
LE: loop exit
PB: predicated region body
PF: predicated region fallthrough
CT: control target
= control target key end

     0   :  { %7 = vsyncpa [#allocation6], 0  ;;  %s1454_s0 = inlined_call_operand.hbm [shape: f32[2,3,32,128], index: 0, kind: input, shape index: {}]   ;;  %s1455_s1 = inlined_call_operand.hbm [shape: s32[2,32,128], index: 1, kind: input, shape index: {}]   ;;  %s1456_s2 = inlined_call_operand.hbm [shape: f32[2,8,128], index: 2, kind: output, shape index: {}]  }
   0x1   :  { %9 = vsyncpa [#allocation6 + $0x1], 0 }
   0x2   :  { %10 = vsyncpa [#allocation9], 0 }
   0x3   :  { %12 = vsyncpa [#allocation9 + $0x1], 0 }
   0x4   :  { %13 = vsyncpa [#allocation7], 0 }
   0x5   :  { %15 = vsyncpa [#allocation7 + $0x1], 0  ;;  %s1129_s9 = smov 0   ;;  %s1131_s10 = smov 0  }
   0x6   :  { %s1133_s11 = smov 0   ;;  %s1135_s12 = smov 0  }
   0x7   :  { %s1137_s13 = smov 0   ;;  %s1139_s14 = smov 0  }
   0x8 LB: > { %s789_s15 = sadd.s32 4294967295, %s1109_s14   ;;  %s790_s16 = sadd.s32 4294967294, %s1109_s14   ;;  %s1109_s14 = sphi %s1139_s14, %s21_s14   ;;  %s1105_s13 = sphi %s1137_s13, %s1483_s13   ;;  %s1101_s12 = sphi %s1135_s12, %s1482_s12   ;;  %s1097_s11 = sphi %s1133_s11, %s1481_s11   ;;  %s1093_s10 = sphi %s1131_s10, %s1480_s10   ;;  %s1089_s9 = sphi %s1129_s9, %s1479_s9  }
   0x9   : > { %s33_s17 = sadd.s32 1, %s1105_s13  ;;  %s42_s18 = sadd.s32 1, %s1097_s11 }
   0xa   : > { %p35_p0 = scmp.ge.s32.totalorder %s33_s17, 2  ;;  %p49_p1 = scmp.ne.s32.totalorder %s1097_s11, %s1093_s10 }
   0xb   : > { %p50_p2 = scmp.eq.s32.totalorder %s1109_s14, 0  ;;  %p55_p3 = scmp.ne.s32.totalorder %s1093_s10, %s1089_s9 }
   0xc   : > { %s1485_s17 = smov (%p35_p0, %s33_s17), 0  ;;  %p56_p5 = scmp.eq.s32.totalorder %s789_s15, 0 }
   0xd   : > { %p1170_p4 = por %p50_p2, %p49_p1  ;;  %s37_s20 = ssub.s32 %s1105_s13, %s1485_s17 }
   0xe   : > { %p107_p6 = scmp.eq.s32.totalorder %s789_s15, 1  ;;  %p40_p7 = scmp.eq.s32.totalorder %s37_s20, 0 }
   0xf   : > { %p1176_p8 = por %p56_p5, %p55_p3  ;;  %p113_p10 = scmp.eq.s32.totalorder %s790_s16, 1 }
  0x10   : > { %p1180_p9 = por %p107_p6, %p49_p1  ;;  %p792_p12 = scmp.ge.s32.totalorder %s1109_s14, 2 }
  0x11   : > { %s1185_s23 = scalar_select %p40_p7, %s1097_s11, %s42_s18  }
  0x12   : > { %p1187_p11 = por %p113_p10, %p55_p3  ;;  %p872_p13 = scmp.lt.s32.totalorder %s1109_s14, 2 }
  0x13   : > { %s1194_s25 = sand.u32 1, %s1097_s11   ;;  %s829_s27 = smul.u32 96, %s1105_s13 }
  0x14   : > { %s828_s26 = smul.u32 96, %s1194_s25  ;;  %p1200_p0 = pnand %p872_p13, %p1170_p4 }
  0x15   : > { %s144_s3 = scalar_lea.hbm %s1454_s0, %s829_s27  ;;  %p797_p1 = scmp.ge.s32.totalorder %s1109_s14, 1 }
  0x16   : > { %s137_s4 = scalar_lea.vmem [#allocation5], %s828_s26  ;;  %s145_s6 = sshll.u32 %s144_s3, 4  ;;  %s146_s6 = int_to_ptr.hbm [resolvable:$true] %s145_s6 }
  0x17   : > { %s147_s5 = sshll.u32 %s137_s4, 4  ;;  %s134_s7 = scalar_lea.sflag [#allocation6], %s1194_s25  ;;  %s148_s5 = int_to_ptr.vmem [resolvable:$true] %s147_s5 }
  0x18   : > { %s1111_s8 = smov 128   ;;  %s1112_s15 = smov 8  }
  0x19   : > { %864 = dma.hbm_to_vmem [thread:$0]  (!%p1200_p0), %s146_s6, 1536, %s148_s5, %s134_s7, %s1111_s8, %s1111_s8, %s1112_s15  }
  0x1a   : > { %p179_p2 = scmp.lt.s32.totalorder %s1109_s14, 3  ;;  %s794_s16 = sshll.u32 %s1194_s25, 5 }
  0x1b   : > { %s827_s18 = sshll.u32 %s1105_s13, 5  ;;  %s161_s27 = scalar_lea.vmem [#allocation8], %s794_s16 }
  0x1c   : > { %p180_p3 = pnand %p797_p1, %p179_p2  ;;  %s168_s26 = scalar_lea.hbm %s1455_s1, %s827_s18 }
  0x1d   : > { %s171_s29 = sshll.u32 %s161_s27, 4  ;;  %s169_s30 = sshll.u32 %s168_s26, 4  ;;  %s172_s29 = int_to_ptr.vmem [resolvable:$true] %s171_s29  ;;  %s170_s30 = int_to_ptr.hbm [resolvable:$true] %s169_s30 }
  0x1e   : > { %s158_s3 = scalar_lea.sflag [#allocation9], %s1194_s25  ;;  %183 = sbr.rel (%p180_p3) target bundleno = 516 (0x204), region = 28 }
  0x1f   : > { %867 = dma.hbm_to_vmem [thread:$0]  (!%p1200_p0), %s170_s30, 512, %s172_s29, %s158_s3, %s1111_s8, %s1111_s8, %s1112_s15  }
  0x20   : > { %s1221_s4 = sand.u32 (!%p180_p3), 1, %s1093_s10  }
  0x21   : > { %s830_s5 = smul.u32 (!%p180_p3), 96, %s1221_s4  ;;  %s186_s6 = scalar_lea.sflag (!%p180_p3), [#allocation6], %s1221_s4 }
  0x23   : > { %s189_s7 = scalar_lea.vmem [#allocation5], %s830_s5 }
  0x24   : > { %1076 = dma.done.wait (%p1176_p8), %s186_s6, 1536  }
  0x25   : > { %1078 = vsyncadd (%p1176_p8), %s186_s6, 4294965760  ;;  %s798_s25 = sshll.u32 %s1221_s4, 5  ;;  %s196_s28 = scalar_lea.sflag [#allocation9], %s1221_s4 }
  0x26   : > { %s1231_s8 = scalar_lea.vmem [#allocation8], %s798_s25 }
  0x27   : > { %1080 = dma.done.wait (%p1176_p8), %s196_s28, 512  }
  0x28   : > { %1082 = vsyncadd (%p1176_p8), %s196_s28, 4294966784  ;;  %v246_v0 = vld [vmem:[%s189_s7] sm:$0xff]  ;;  %v247_v1 = vld [vmem:[%s189_s7 + $0x8] sm:$0xff]  ;;  %v1113_v53 = vmov 0.0  }
  0x29   : > { %v248_v2 = vld [vmem:[%s189_s7 + $0x10] sm:$0xff]  ;;  %v249_v3 = vld [vmem:[%s189_s7 + $0x18] sm:$0xff]  ;;  %v800_v4 = vld [vmem:[%s189_s7 + $0x20] sm:$0xff] }
  0x2a   : > { %v801_v5 = vld [vmem:[%s189_s7 + $0x28] sm:$0xff]  ;;  %v802_v6 = vld [vmem:[%s189_s7 + $0x30] sm:$0xff]  ;;  %v803_v7 = vld [vmem:[%s189_s7 + $0x38] sm:$0xff]  ;;  %v262_v8 = vmax.f32 %v246_v0, %v800_v4 }
  0x2b   : > { %v804_v9 = vld [vmem:[%s189_s7 + $0x40] sm:$0xff]  ;;  %v805_v10 = vld [vmem:[%s189_s7 + $0x48] sm:$0xff]  ;;  %v806_v11 = vld [vmem:[%s189_s7 + $0x50] sm:$0xff]  ;;  %v263_v12 = vmax.f32 %v247_v1, %v801_v5  ;;  %v264_v13 = vmax.f32 %v248_v2, %v802_v6  ;;  %v265_v14 = vmax.f32 %v249_v3, %v803_v7 }
  0x2c   : > { %v807_v15 = vld [vmem:[%s189_s7 + $0x58] sm:$0xff]  ;;  %v266_v16 = vmax.f32 %v262_v8, %v804_v9  ;;  %v1238_v40 = vld [vmem:[%s1231_s8] sm:$0xff]  ;;  %v1241_v41 = vld [vmem:[%s1231_s8 + $0x8] sm:$0xff] }
  0x2d   : > { %v267_v17 = vmax.f32 %v263_v12, %v805_v10  ;;  %v268_v18 = vmax.f32 %v264_v13, %v806_v11  ;;  %v269_v19 = vmax.f32 %v265_v14, %v807_v15  ;;  %v1246_v45 = vld [vmem:[%s1231_s8 + $0x10] sm:$0xff]  ;;  %vm374_vm0 = vcmp.eq.s32.totalorder %v1238_v40, 0  ;;  %v1255_v50 = vld [vmem:[%s1231_s8 + $0x18] sm:$0xff] }
  0x2e   : > { %v270_v20 = vsub.f32 %v246_v0, %v266_v16  ;;  %v282_v21 = vsub.f32 %v800_v4, %v266_v16  ;;  %v294_v33 = vsub.f32 %v804_v9, %v266_v16  ;;  %vm375_vm1 = vcmp.eq.s32.totalorder %v1241_v41, 0 }
  0x2f   : > { %v271_v22 = vsub.f32 %v247_v1, %v267_v17  ;;  %v272_v23 = vsub.f32 %v248_v2, %v268_v18  ;;  %v273_v24 = vsub.f32 %v249_v3, %v269_v19  ;;  %v283_v25 = vsub.f32 %v801_v5, %v267_v17 }
  0x30   : > { %v274_v26 = vmul.f32 1.442695, %v270_v20  ;;  %v284_v27 = vsub.f32 %v802_v6, %v268_v18  ;;  %v285_v31 = vsub.f32 %v803_v7, %v269_v19  ;;  %v286_v32 = vmul.f32 1.442695, %v282_v21 }
  0x31   : > { %v276_v28 = vmul.f32 1.442695, %v271_v22  ;;  %v278_v29 = vmul.f32 1.442695, %v272_v23  ;;  %v280_v30 = vmul.f32 1.442695, %v273_v24  ;;  %v295_v35 = vsub.f32 %v805_v10, %v267_v17 }
  0x32   : > { %925 = vpow2.f32 %v274_v26  ;;  %v288_v34 = vmul.f32 1.442695, %v283_v25  ;;  %v290_v36 = vmul.f32 1.442695, %v284_v27  ;;  %v296_v37 = vsub.f32 %v806_v11, %v268_v18 }
  0x33   : > { %927 = vpow2.f32 %v276_v28  ;;  %v292_v38 = vmul.f32 1.442695, %v285_v31  ;;  %v297_v39 = vsub.f32 %v807_v15, %v269_v19  ;;  %v298_v42 = vmul.f32 1.442695, %v294_v33 }
  0x34   : > { %929 = vpow2.f32 %v278_v29  ;;  %v300_v43 = vmul.f32 1.442695, %v295_v35  ;;  %v302_v46 = vmul.f32 1.442695, %v296_v37  ;;  %vm376_vm2 = vcmp.eq.s32.totalorder %v1246_v45, 0 }
  0x35   : > { %931 = vpow2.f32 %v280_v30  ;;  %v304_v48 = vmul.f32 1.442695, %v297_v39  ;;  %v1263_v54 = vsel %vm374_vm0, 1.0, %v1113_v53  ;;  %v1266_v55 = vsel %vm375_vm1, 1.0, %v1113_v53 }
  0x36   : > { %933 = vpow2.f32 %v286_v32  ;;  %vm377_vm3 = vcmp.eq.s32.totalorder %v1255_v50, 0  ;;  %v398_v58 = vadd.f32 %v1266_v55, %v1263_v54  ;;  %v1280_v61 = vsel %vm376_vm2, 1.0, %v1113_v53 }
  0x37   : > { %935 = vpow2.f32 %v288_v34  ;;  %v1292_v3 = vsel %vm377_vm3, 1.0, %v1113_v53  ;;  %vm406_vm15 = vcmp.eq.s32.totalorder %v1238_v40, 1  ;;  %vm407_vm0 = vcmp.eq.s32.totalorder %v1241_v41, 1 }
  0x38   : > { %v1243_v44 = vpop.eup %925  ;;  %937 = vpow2.f32 %v290_v36  ;;  %v399_v0 = vadd.f32 %v1280_v61, %v398_v58  ;;  %vm409_vm1 = vcmp.eq.s32.totalorder %v1255_v50, 1 }
  0x39   : > { %v1248_v47 = vpop.eup %927  ;;  %939 = vpow2.f32 %v292_v38 }
  0x3a   : > { %v1252_v49 = vpop.eup %929  ;;  %941 = vpow2.f32 %v298_v42  ;;  %v400_v6 = vadd.f32 %v1292_v3, %v399_v0 }
  0x3b   : > { %v1257_v51 = vpop.eup %931  ;;  %943 = vpow2.f32 %v300_v43 }
  0x3c   : > { %v1260_v52 = vpop.eup %933  ;;  %945 = vpow2.f32 %v302_v46  ;;  %524 = vadd.xlane.f32.xlu1 %v400_v6  ;;  %v812_v6 = vsel %vm406_vm15, 1.0, %v1113_v53 }
  0x3d   : > { %v1268_v56 = vpop.eup %935  ;;  %947 = vpow2.f32 %v304_v48  ;;  %v306_v57 = vadd.f32 %v1260_v52, %v1243_v44 }
  0x3e   : > { %v1275_v59 = vpop.eup %937  ;;  %v307_v60 = vadd.f32 %v1268_v56, %v1248_v47 }
  0x3f   : > { %v1282_v62 = vpop.eup %939  ;;  %v308_v63 = vadd.f32 %v1275_v59, %v1252_v49 }
  0x40   : > { %v1287_v1 = vpop.eup %941  ;;  %v309_v2 = vadd.f32 %v1282_v62, %v1257_v51 }
  0x41   : > { %v1294_v4 = vpop.eup %943  ;;  %v310_v5 = vadd.f32 %v1287_v1, %v306_v57 }
  0x42   : > { %v1298_v7 = vpop.eup %945  ;;  %v311_v8 = vadd.f32 %v1294_v4, %v307_v60 }
  0x43   : > { %v1301_v9 = vpop.eup %947  ;;  %v312_v10 = vadd.f32 %v1298_v7, %v308_v63  ;;  %949 = vrcp.f32 %v310_v5  ;;  %v323_v12 = vand.u32 2147483647, %v310_v5  ;;  %v325_v13 = vand.u32 2147483648, %v310_v5 }
  0x44   : > { %v313_v11 = vadd.f32 %v1301_v9, %v309_v2  ;;  %951 = vrcp.f32 %v311_v8  ;;  %v337_v14 = vand.u32 2147483647, %v311_v8  ;;  %v339_v15 = vand.u32 2147483648, %v311_v8 }
  0x45   : > { %953 = vrcp.f32 %v312_v10  ;;  %v351_v16 = vand.u32 2147483647, %v312_v10  ;;  %v353_v17 = vand.u32 2147483648, %v312_v10  ;;  %vm319_vm4 = vweird.f32 %v310_v5 }
  0x46   : > { %955 = vrcp.f32 %v313_v11  ;;  %vm1305_vm5 = vcmp.eq.f32.partialorder %v323_v12, 8.507059e+37  ;;  %vm333_vm6 = vweird.f32 %v311_v8  ;;  %v326_v22 = vor.u32 1.1754944e-38, %v325_v13 }
  0x47   : > { %vm1309_vm7 = vcmp.eq.f32.partialorder %v337_v14, 8.507059e+37  ;;  %vm347_vm8 = vweird.f32 %v312_v10  ;;  %v340_v26 = vor.u32 1.1754944e-38, %v339_v15  ;;  %vm1313_vm9 = vcmp.eq.f32.partialorder %v351_v16, 8.507059e+37 }
  0x48   : > { %vm361_vm10 = vweird.f32 %v313_v11  ;;  %v354_v30 = vor.u32 1.1754944e-38, %v353_v17  ;;  %v365_v33 = vand.u32 2147483647, %v313_v11  ;;  %v367_v34 = vand.u32 2147483648, %v313_v11 }
  0x49   : > { %v950_v18 = vpop.eup %949  ;;  %v813_v13 = vsel %vm407_vm0, 1.0, %v1113_v53 }
  0x4a   : > { %v952_v20 = vpop.eup %951  ;;  %v315_v21 = vmul.f32 %v950_v18, %v310_v5  ;;  %vm320_vm11 = vweird.f32 %v950_v18  ;;  %v368_v63 = vor.u32 1.1754944e-38, %v367_v34 }
  0x4b   : > { %v954_v24 = vpop.eup %953  ;;  %v329_v25 = vmul.f32 %v952_v20, %v311_v8  ;;  %vm334_vm12 = vweird.f32 %v952_v20  ;;  %vm1318_vm14 = vmor %vm319_vm4, %vm320_vm11  ;;  %vm1335_vm11 = vcmp.eq.f32.partialorder %v365_v33, 8.507059e+37 }
  0x4c   : > { %v316_v28 = vsub.f32 1.0, %v315_v21  ;;  %v343_v29 = vmul.f32 %v954_v24, %v312_v10  ;;  %v956_v31 = vpop.eup %955  ;;  %vm348_vm13 = vweird.f32 %v954_v24  ;;  %vm1326_vm2 = vmor %vm333_vm6, %vm334_vm12 }
  0x4d   : > { %v330_v32 = vsub.f32 1.0, %v329_v25  ;;  %v357_v37 = vmul.f32 %v956_v31, %v313_v11  ;;  %vm362_vm3 = vweird.f32 %v956_v31  ;;  %vm1331_vm4 = vmor %vm347_vm8, %vm348_vm13  ;;  %vm1478_vm8 = vcmp.eq.s32.totalorder %v1246_v45, 1 }
  0x4e   : > { %v317_v35 = vmul.f32 %v950_v18, %v316_v28  ;;  %v344_v36 = vsub.f32 1.0, %v343_v29  ;;  %vm1350_vm6 = vmor %vm361_vm10, %vm362_vm3  ;;  %v814_v14 = vsel %vm1478_vm8, 1.0, %v1113_v53  ;;  %vm441_vm10 = vcmp.eq.s32.totalorder %v1255_v50, 2 }
  0x4f   : > { %v331_v39 = vmul.f32 %v952_v20, %v330_v32  ;;  %v358_v48 = vsub.f32 1.0, %v357_v37 }
  0x50   : > { %v318_v42 = vadd.f32 %v950_v18, %v317_v35  ;;  %v345_v46 = vmul.f32 %v954_v24, %v344_v36 }
  0x51   : > { %v332_v57 = vadd.f32 %v952_v20, %v331_v39  ;;  %v359_v5 = vmul.f32 %v956_v31, %v358_v48 }
  0x52   : > { %v322_v0 = vsel %vm1318_vm14, %v950_v18, %v318_v42  ;;  %v346_v2 = vadd.f32 %v954_v24, %v345_v46 }
  0x53   : > { %v327_v8 = vsel %vm1305_vm5, %v326_v22, %v322_v0  ;;  %v336_v10 = vsel %vm1326_vm2, %v952_v20, %v332_v57  ;;  %v360_v17 = vadd.f32 %v956_v31, %v359_v5  ;;  %vm438_vm5 = vcmp.eq.s32.totalorder %v1238_v40, 2 }
  0x54   : > { %v341_v15 = vsel %vm1309_vm7, %v340_v26, %v336_v10  ;;  %v350_v16 = vsel %vm1331_vm4, %v954_v24, %v346_v2  ;;  %v370_v11 = vmul.f32 %v1243_v44, %v327_v8  ;;  %v402_v20 = vmul.f32 %v1260_v52, %v327_v8 }
  0x55   : > { %v355_v18 = vsel %vm1313_vm9, %v354_v30, %v350_v16  ;;  %v371_v19 = vmul.f32 %v1248_v47, %v341_v15  ;;  %v403_v21 = vmul.f32 %v1268_v56, %v341_v15  ;;  %v364_v22 = vsel %vm1350_vm6, %v956_v31, %v360_v17 }
  0x56   : > { %v372_v23 = vmul.f32 %v1252_v49, %v355_v18  ;;  %v386_v25 = vmul.f32 %v1263_v54, %v370_v11  ;;  %v404_v24 = vmul.f32 %v1275_v59, %v355_v18  ;;  %v369_v44 = vsel %vm1335_vm11, %v368_v63, %v364_v22 }
  0x57   : > { %v387_v26 = vmul.f32 %v1266_v55, %v371_v19  ;;  %v426_v27 = vadd.f32 %v403_v21, %v402_v20  ;;  %v815_v47 = vsel %vm409_vm1, 1.0, %v1113_v53  ;;  %v373_v52 = vmul.f32 %v1257_v51, %v369_v44 }
  0x58   : > { %v388_v56 = vmul.f32 %v1280_v61, %v372_v23  ;;  %v405_v49 = vmul.f32 %v1282_v62, %v369_v44  ;;  %v418_v28 = vmul.f32 %v812_v6, %v402_v20  ;;  %v419_v59 = vmul.f32 %v813_v13, %v403_v21 }
  0x59   : > { %v390_v54 = vadd.f32 %v387_v26, %v386_v25  ;;  %v427_v29 = vadd.f32 %v426_v27, %v404_v24  ;;  %v430_v30 = vadd.f32 %v813_v13, %v812_v6  ;;  %v389_v31 = vmul.f32 %v1292_v3, %v373_v52 }
  0x5a   : > { %v394_v32 = vadd.f32 %v371_v19, %v370_v11  ;;  %v420_v55 = vmul.f32 %v814_v14, %v404_v24  ;;  %v421_v35 = vmul.f32 %v815_v47, %v405_v49  ;;  %v422_v36 = vadd.f32 %v419_v59, %v418_v28 }
  0x5b   : > { %v391_v33 = vadd.f32 %v390_v54, %v388_v56  ;;  %v428_v34 = vadd.f32 %v427_v29, %v405_v49  ;;  %v431_v38 = vadd.f32 %v814_v14, %v430_v30  ;;  %v434_v3 = vmul.f32 %v1287_v1, %v327_v8 }
  0x5c   : > { %v423_v51 = vadd.f32 %v422_v36, %v420_v55  ;;  %v395_v61 = vadd.f32 %v394_v32, %v372_v23  ;;  %v435_v43 = vmul.f32 %v1294_v4, %v341_v15  ;;  %v436_v46 = vmul.f32 %v1298_v7, %v355_v18 }
  0x5d   : > { %v392_v37 = vadd.f32 %v391_v33, %v389_v31  ;;  %566 = vadd.xlane.f32.xlu2 %v428_v34  ;;  %v432_v39 = vadd.f32 %v815_v47, %v431_v38  ;;  %v437_v48 = vmul.f32 %v1301_v9, %v369_v44  ;;  %vm439_vm7 = vcmp.eq.s32.totalorder %v1241_v41, 2 }
  0x5e   : > { %v424_v62 = vadd.f32 %v423_v51, %v421_v35  ;;  %v396_v42 = vadd.f32 %v395_v61, %v373_v52  ;;  %vm440_vm9 = vcmp.eq.s32.totalorder %v1246_v45, 2  ;;  %v458_v57 = vadd.f32 %v435_v43, %v434_v3 }
  0x5f   : > { %503 = vadd.xlane.f32.xlu0 %v392_v37  ;;  %v816_v58 = vsel %vm438_vm5, 1.0, %v1113_v53  ;;  %v817_v60 = vsel %vm439_vm7, 1.0, %v1113_v53  ;;  %v818_v1 = vsel %vm440_vm9, 1.0, %v1113_v53  ;;  %v819_v4 = vsel %vm441_vm10, 1.0, %v1113_v53 }
  0x60   : > { %556 = vadd.xlane.f32.xlu1 %v424_v62  ;;  %v450_v7 = vmul.f32 %v816_v58, %v434_v3  ;;  %v451_v63 = vmul.f32 %v817_v60, %v435_v43  ;;  %v452_v9 = vmul.f32 %v818_v1, %v436_v46  ;;  %v459_v0 = vadd.f32 %v458_v57, %v436_v46 }
  0x61   : > { %v462_v40 = vadd.f32 %v817_v60, %v816_v58  ;;  %v453_v2 = vmul.f32 %v819_v4, %v437_v48 }
  0x62   : > { %v454_v41 = vadd.f32 %v451_v63, %v450_v7  ;;  %v460_v5 = vadd.f32 %v459_v0, %v437_v48 }
  0x63   : > { %v463_v45 = vadd.f32 %v818_v1, %v462_v40 }
  0x64   : > { %v455_v50 = vadd.f32 %v454_v41, %v452_v9 }
  0x65   : > { %577 = vadd.xlane.f32.xlu2 %v432_v39  ;;  %v464_v8 = vadd.f32 %v819_v4, %v463_v45 }
  0x66   : > { %v456_v10 = vadd.f32 %v455_v50, %v453_v2 }
  0x67   : > { %513 = vadd.xlane.f32.xlu0 %v396_v42 }
  0x68   : > { %619 = vadd.xlane.f32.xlu1 %v460_v5 }
  0x6d   : > { %630 = vadd.xlane.f32.xlu2 %v464_v8 }
  0x6f   : > { %609 = vadd.xlane.f32.xlu0 %v456_v10 }
  0xaf   : > { %v525_v6 = vpop.xlane.xlu1 %524 }
  0xb0   : > { %v526_v13 = vrot.slane %v525_v6, 4 }
  0xb2   : > { %v527_v15 = vadd.f32 %v526_v13, %v525_v6 }
  0xb4   : > { %v528_v11 = vrot.slane %v527_v15, 2 }
  0xb6   : > { %v529_v23 = vadd.f32 %v528_v11, %v527_v15 }
  0xb8   : > { %v530_v44 = vrot.slane %v529_v23, 1 }
  0xba   : > { %v531_v47 = vadd.f32 %v530_v44, %v529_v23 }
  0xd0   : > { %v567_v52 = vpop.xlane.xlu2 %566 }
  0xd1   : > { %v568_v54 = vrot.slane %v567_v52, 4 }
  0xd2   : > { %v504_v12 = vpop.xlane.xlu0 %503 }
  0xd3   : > { %v505_v14 = vrot.slane %v504_v12, 4  ;;  %v557_v56 = vpop.xlane.xlu1 %556  ;;  %v569_v31 = vadd.f32 %v568_v54, %v567_v52 }
  0xd4   : > { %v558_v28 = vrot.slane %v557_v56, 4 }
  0xd5   : > { %v506_v53 = vadd.f32 %v505_v14, %v504_v12  ;;  %v570_v33 = vrot.slane %v569_v31, 2 }
  0xd6   : > { %v559_v30 = vadd.f32 %v558_v28, %v557_v56 }
  0xd7   : > { %v507_v16 = vrot.slane %v506_v53, 2  ;;  %v571_v38 = vadd.f32 %v570_v33, %v569_v31 }
  0xd8   : > { %v578_v49 = vpop.xlane.xlu2 %577  ;;  %v560_v55 = vrot.slane %v559_v30, 2 }
  0xd9   : > { %v508_v17 = vadd.f32 %v507_v16, %v506_v53  ;;  %v579_v29 = vrot.slane %v578_v49, 4  ;;  %v572_v46 = vrot.slane %v571_v38, 1 }
  0xda   : > { %v514_v18 = vpop.xlane.xlu0 %513  ;;  %v561_v37 = vadd.f32 %v560_v55, %v559_v30 }
  0xdb   : > { %v515_v19 = vrot.slane %v514_v18, 4  ;;  %v509_v20 = vrot.slane %v508_v17, 1  ;;  %v580_v32 = vadd.f32 %v579_v29, %v578_v49  ;;  %v573_v4 = vadd.f32 %v572_v46, %v571_v38  ;;  %v620_v9 = vpop.xlane.xlu1 %619 }
  0xdc   : > { %v562_v3 = vrot.slane %v561_v37, 1  ;;  %v621_v2 = vrot.slane %v620_v9, 4 }
  0xdd   : > { %v516_v21 = vadd.f32 %v515_v19, %v514_v18  ;;  %v510_v22 = vadd.f32 %v509_v20, %v508_v17  ;;  %v581_v35 = vrot.slane %v580_v32, 2 }
  0xde   : > { %v563_v1 = vadd.f32 %v562_v3, %v561_v37  ;;  %v622_v6 = vadd.f32 %v621_v2, %v620_v9 }
  0xdf   : > { %v517_v25 = vrot.slane %v516_v21, 2  ;;  %831 = vpush %v510_v22  ;;  %v582_v62 = vadd.f32 %v581_v35, %v580_v32 }
  0xe0   : > { %v631_v0 = vpop.xlane.xlu2 %630  ;;  %v623_v10 = vrot.slane %v622_v6, 2 }
  0xe1   : > { %v518_v24 = vadd.f32 %v517_v25, %v516_v21  ;;  %v583_v57 = vrot.slane %v582_v62, 1  ;;  %v632_v41 = vrot.slane %v631_v0, 4 }
  0xe2   : > { %v610_v63 = vpop.xlane.xlu0 %609  ;;  %v624_v16 = vadd.f32 %v623_v10, %v622_v6 }
  0xe3   : > { %v519_v26 = vrot.slane %v518_v24, 1  ;;  %v584_v7 = vadd.f32 %v583_v57, %v582_v62  ;;  %v611_v40 = vrot.slane %v610_v63, 4  ;;  %v633_v50 = vadd.f32 %v632_v41, %v631_v0 }
  0xe4   : > { %v625_v22 = vrot.slane %v624_v16, 1 }
  0xe5   : > { %v520_v27 = vadd.f32 %v519_v26, %v518_v24  ;;  %v612_v45 = vadd.f32 %v611_v40, %v610_v63  ;;  %v634_v13 = vrot.slane %v633_v50, 2 }
  0xe7   : > { %833 = vpush %v520_v27  ;;  %v613_v8 = vrot.slane %v612_v45, 2  ;;  %v635_v17 = vadd.f32 %v634_v13, %v633_v50  ;;  %v626_v27 = vadd.f32 %v625_v22, %v624_v16 }
  0xe8   : > { %835 = vpush %v531_v47 }
  0xe9   : > { %v614_v53 = vadd.f32 %v613_v8, %v612_v45  ;;  %v636_v25 = vrot.slane %v635_v17, 1 }
  0xeb   : > { %v615_v20 = vrot.slane %v614_v53, 1  ;;  %v637_v47 = vadd.f32 %v636_v25, %v635_v17 }
  0xed   : > { %v616_v26 = vadd.f32 %v615_v20, %v614_v53 }
 0x110   : > { %s1397_s21 = spop %831 }
 0x111   : > { %s533_s26 = smul.f32 2.0, %s1397_s21 }
 0x113   : > { %s1400_s27 = sadd.f32 1e-06, %s533_s26 }
 0x118   : > { %s834_s15 = spop %833 }
 0x119   : > { %s820_s16 = sadd.f32 -1280.0, %s834_s15  ;;  %s836_s18 = spop %835 }
 0x11b   : > { %s535_s19 = sadd.f32 %s836_s18, %s820_s16 }
 0x11d   : > { %s536_s20 = sadd.f32 1e-06, %s535_s19 }
 0x11f   : > { %v537_v59 = vstv %s536_s20 }
 0x120   : > { %957 = vrcp.f32 %v537_v59  ;;  %v549_v61 = vand.u32 2147483648, %v537_v59  ;;  %v547_v42 = vand.u32 2147483647, %v537_v59  ;;  %vm543_vm13 = vweird.f32 %v537_v59 }
 0x122   : > { %v550_v48 = vor.u32 1.1754944e-38, %v549_v61  ;;  %vm548_vm15 = vcmp.eq.f32.partialorder %v547_v42, 8.507059e+37 }
 0x126   : > { %v958_v34 = vpop.eup %957 }
 0x127   : > { %v539_v36 = vmul.f32 %v958_v34, %v537_v59  ;;  %vm544_vm12 = vweird.f32 %v958_v34 }
 0x128   : > { %vm545_vm14 = vmor %vm543_vm13, %vm544_vm12 }
 0x129   : > { %v540_v51 = vsub.f32 1.0, %v539_v36 }
 0x12b   : > { %v541_v39 = vmul.f32 %v958_v34, %v540_v51 }
 0x12d   : > { %v542_v43 = vadd.f32 %v958_v34, %v541_v39 }
 0x12f   : > { %v546_v58 = vsel %vm545_vm14, %v958_v34, %v542_v43 }
 0x130   : > { %v551_v60 = vsel %vm548_vm15, %v550_v48, %v546_v58 }
 0x131   : > { %837 = vpush %v551_v60 }
 0x132   : > { %839 = vpush %v563_v1 }
 0x133   : > { %841 = vpush %v573_v4 }
 0x134   : > { %843 = vpush %v584_v7 }
 0x162   : > { %s1402_s29 = spop %837 }
 0x163   : > { %s553_s30 = smul.f32 %s1402_s29, %s1400_s27  ;;  %s1406_s3 = spop %839 }
 0x164   : > { %s842_s5 = spop %841  ;;  %s586_s8 = smul.f32 2.0, %s1406_s3 }
 0x165   : > { %s821_s6 = sadd.f32 -1280.0, %s842_s5  ;;  %s844_s7 = spop %843 }
 0x166   : > { %s587_s21 = sadd.f32 1e-06, %s586_s8  ;;  %s799_s27 = sshll.u32 %s1221_s4, 3 }
 0x167   : > { %s588_s25 = sadd.f32 %s844_s7, %s821_s6 }
 0x169   : > { %s589_s28 = sadd.f32 1e-06, %s588_s25 }
 0x16b   : > { %v590_v5 = vstv %s589_s28 }
 0x16c   : > { %959 = vrcp.f32 %v590_v5  ;;  %v602_v11 = vand.u32 2147483648, %v590_v5  ;;  %v600_v19 = vand.u32 2147483647, %v590_v5  ;;  %vm596_vm1 = vweird.f32 %v590_v5 }
 0x16e   : > { %v603_v23 = vor.u32 1.1754944e-38, %v602_v11  ;;  %vm601_vm3 = vcmp.eq.f32.partialorder %v600_v19, 8.507059e+37 }
 0x172   : > { %v960_v12 = vpop.eup %959 }
 0x173   : > { %v592_v14 = vmul.f32 %v960_v12, %v590_v5  ;;  %vm597_vm0 = vweird.f32 %v960_v12 }
 0x174   : > { %vm598_vm2 = vmor %vm596_vm1, %vm597_vm0 }
 0x175   : > { %v593_v15 = vsub.f32 1.0, %v592_v14 }
 0x177   : > { %v594_v18 = vmul.f32 %v960_v12, %v593_v15 }
 0x179   : > { %v595_v21 = vadd.f32 %v960_v12, %v594_v18 }
 0x17b   : > { %v599_v24 = vsel %vm598_vm2, %v960_v12, %v595_v21 }
 0x17c   : > { %v604_v44 = vsel %vm601_vm3, %v603_v23, %v599_v24 }
 0x17d   : > { %845 = vpush %v604_v44 }
 0x17e   : > { %847 = vpush %v616_v26 }
 0x17f   : > { %849 = vpush %v626_v27 }
 0x180   : > { %851 = vpush %v637_v47 }
 0x1ae   : > { %s846_s15 = spop %845 }
 0x1af   : > { %s606_s16 = smul.f32 %s846_s15, %s587_s21  ;;  %s848_s18 = spop %847 }
 0x1b0   : > { %s850_s19 = spop %849  ;;  %s639_s29 = smul.f32 2.0, %s848_s18 }
 0x1b1   : > { %s1412_s20 = sadd.f32 %s606_s16, %s553_s30  ;;  %s852_s5 = spop %851 }
 0x1b2   : > { %s822_s26 = sadd.f32 -1280.0, %s850_s19  ;;  %s824_s30 = sshll.u32 %s1101_s12, 3 }
 0x1b3   : > { %s675_s28 = scalar_lea.hbm %s1456_s2, %s824_s30  ;;  %s640_s8 = sadd.f32 1e-06, %s639_s29 }
 0x1b4   : > { %s641_s6 = sadd.f32 %s852_s5, %s822_s26  ;;  %s225_s15 = scalar_lea.vmem [#allocation10], %s799_s27 }
 0x1b5   : > { %s677_s16 = sshll.u32 %s225_s15, 4  ;;  %s679_s26 = sshll.u32 %s675_s28, 4  ;;  %s678_s16 = int_to_ptr.vmem [resolvable:$true] %s677_s16  ;;  %s680_s26 = int_to_ptr.hbm [resolvable:$true] %s679_s26 }
 0x1b6   : > { %s642_s7 = sadd.f32 1e-06, %s641_s6  ;;  %s665_s6 = scalar_lea.sflag [#allocation7], %s1221_s4 }
 0x1b7   : > { %s1043_s27 = scalar_lea.hbm %s1456_s2, 16 }
 0x1b8   : > { %v643_v52 = vstv %s642_s7  ;;  %s1037_s7 = sshra.s32 %s680_s26, 4  ;;  %s1038_s7 = int_to_ptr.hbm [resolvable:$true] %s1037_s7 }
 0x1b9   : > { %961 = vrcp.f32 %v643_v52  ;;  %v655_v54 = vand.u32 2147483648, %v643_v52  ;;  %v653_v59 = vand.u32 2147483647, %v643_v52  ;;  %vm649_vm11 = vweird.f32 %v643_v52  ;;  %s1039_s12 = scalar_lea.hbm %s1038_s7, 8  ;;  %p1044_p7 = scmp.lt.s32.totalorder %s1038_s7, %s1456_s2 }
 0x1ba   : > { %p1040_p4 = scmp.ne.s32.totalorder %s1038_s7, %s1039_s12  ;;  %p1045_p8 = scmp.lt.s32.totalorder %s1043_s27, %s1039_s12 }
 0x1bb   : > { %v656_v31 = vor.u32 1.1754944e-38, %v655_v54  ;;  %vm654_vm8 = vcmp.eq.f32.partialorder %v653_v59, 8.507059e+37 }
 0x1bc   : > { %p1041_p5 = pnand %p1040_p4, %p1180_p9  ;;  %p1046_p10 = por %p1045_p8, %p1044_p7 }
 0x1be   : > { %p1042_p6 = pneg %p1041_p5 }
 0x1bf   : > { %v962_v56 = vpop.eup %961 }
 0x1c0   : > { %v645_v49 = vmul.f32 %v962_v56, %v643_v52  ;;  %vm650_vm4 = vweird.f32 %v962_v56  ;;  %p1047_p13 = pnand %p1046_p10, %p1042_p6 }
 0x1c1   : > { %vm651_vm6 = vmor %vm649_vm11, %vm650_vm4 }
 0x1c2   : > { %v646_v28 = vsub.f32 1.0, %v645_v49 }
 0x1c4   : > { %v647_v29 = vmul.f32 %v962_v56, %v646_v28 }
 0x1c6   : > { %v648_v30 = vadd.f32 %v962_v56, %v647_v29 }
 0x1c8   : > { %v652_v32 = vsel %vm651_vm6, %v962_v56, %v648_v30 }
 0x1c9   : > { %v657_v55 = vsel %vm654_vm8, %v656_v31, %v652_v32 }
 0x1ca   : > { %853 = vpush %v657_v55 }
 0x1fb   : > { %s854_s21 = spop %853 }
 0x1fc   : > { %s659_s19 = smul.f32 %s854_s21, %s640_s8 }
 0x1fe   : > { %s660_s5 = sadd.f32 %s659_s19, %s1412_s20 }
 0x200   : > { %v661_v33 = vstv %s660_s5 }
 0x201   : > { %663 = vst [vmem:[%s225_s15] sm:$0xff] %v661_v33 }
 0x202   : > { %1050 = shalt.err (!%p1047_p13)
}
 0x203   : > { %859 = dma.vmem_to_hbm [thread:$0]  (%p1180_p9), %s678_s16, 128, %s680_s26, %s665_s6  }
 0x204 PF: > { %s691_s4 = sand.u32 1, %s1089_s9   ;;  %p869_p0 = pnand %p792_p12, %p1187_p11 }
 0x205   : > { %s692_s20 = scalar_lea.sflag [#allocation7], %s691_s4 }
 0x206   : > { %p870_p1 = pneg %p869_p0 }
 0x208   : > { %1084 = dma.done.wait (%p870_p1), %s692_s20, 128  }
 0x209   : > { %1086 = vsyncadd (%p870_p1), %s692_s20, 4294967168  ;;  %s21_s14 = sadd.s32 1, %s1109_s14   ;;  %s1479_s9 = smov %s1093_s10 }
 0x20a   : > { %p18_p2 = scmp.ge.s32.totalorder %s21_s14, 4   ;;  %s1480_s10 = smov %s1097_s11 }
 0x20b   : > { %s1481_s11 = smov %s1185_s23  ;;  %s1482_s12 = smov %s1105_s13 }
 0x20c   : > { %s1483_s13 = smov %s1485_s17  ;;  %20 = sbr.rel (!%p18_p2) target bundleno = 8 (0x8), region = 102 }
 0x211   :  { %698 = vsyncpa [#allocation6], 1 }
 0x212   :  { %700 = vsyncpa [#allocation6 + $0x1], 1 }
 0x213   :  { %701 = vsyncpa [#allocation9], 1 }
 0x214   :  { %703 = vsyncpa [#allocation9 + $0x1], 1 }
 0x215   :  { %704 = vsyncpa [#allocation7], 1 }
 0x216   :  { %706 = vsyncpa [#allocation7 + $0x1], 1 }

</bundles_post_ra>
